<compile_context>
chip_gen: v6e
topology: v6e:2x2x1
jax: 0.10.0
libtpu: 0.0.40
codegen_flags: <defaults>
</compile_context>

<pallas_src>
import functools

import jax
import jax.numpy as jnp
from jax import lax
from jax.experimental import pallas as pl
from jax.experimental.pallas import tpu as pltpu


# --------------------------------- kernel ------------------------------------

def ulsam_kernel(params_ref, b_pt_ref, x_ref, o_ref, *, num_splits, W):
    """One grid step processes a (TB, C, H*W) block (TB batch elements at once)."""
    TB, C, HW = x_ref.shape
    g = C // num_splits

    # Whole-block load; compute in f32 (single cast for the whole block).
    x = x_ref[...].astype(jnp.float32)                   # (TB, C, HW)

    # Packed per-channel fused parameters: columns [dws_scale, dws_bias, pt_weight, 0].
    a = params_ref[:, 0:1]                                # (C, 1)
    b = params_ref[:, 1:2]                                # (C, 1)
    w = params_ref[:, 2:3]                                # (C, 1)

    # Hoisted boundary masks for the flattened 3x3 max pool (layout-only, computed
    # once per block, broadcast over TB and C).
    col = lax.broadcasted_iota(jnp.int32, (1, 1, HW), 2)
    w_idx = col % W
    left_ok = w_idx > 0               # neighbour (h, w-1) exists
    right_ok = w_idx < (W - 1)        # neighbour (h, w+1) exists
    up_ok = col >= W                  # neighbour (h-1, w) exists
    down_ok = col < (HW - W)          # neighbour (h+1, w) exists

    def roll_lanes(v, shift):
        return pltpu.roll(v, shift=shift % HW, axis=2)

    # Depthwise 1x1 conv + BN + ReLU (fused affine), all batches/channels at once.
    y = jnp.maximum(a * x + b, 0.0)                       # (TB, C, HW)

    # 3x3 max pool, stride 1, pad 1. Zero fill == PyTorch's -inf padding here
    # because y >= 0 (post-ReLU) and every window contains its in-bounds centre.
    t = jnp.maximum(y, jnp.where(left_ok, roll_lanes(y, 1), 0.0))
    t = jnp.maximum(t, jnp.where(right_ok, roll_lanes(y, -1), 0.0))
    p = jnp.maximum(t, jnp.where(up_ok, roll_lanes(t, W), 0.0))
    p = jnp.maximum(p, jnp.where(down_ok, roll_lanes(t, -W), 0.0))

    wp = w * p                                            # (TB, C, HW)

    # Per-subspace pointwise conv (g -> 1) + BN + ReLU, softmax over H*W, then
    # apply and stream the result directly to the output slice (no att_full
    # broadcast/concatenate materialization).
    for s in range(num_splits):                           # num_splits: small, static
        acc = jnp.sum(wp[:, s * g:(s + 1) * g, :], axis=1, keepdims=True) + b_pt_ref[s]
        att = jnp.maximum(acc, 0.0)                       # (TB, 1, HW)
        m = jnp.max(att, axis=2, keepdims=True)
        e = jnp.exp(att - m)
        z = jnp.sum(e, axis=2, keepdims=True)
        att = e * pl.reciprocal(z, approx=True)           # EUP reciprocal (free slot)
        xs = x[:, s * g:(s + 1) * g, :]                   # (TB, g, HW)
        # out = att * x + x  -> stream per-subspace slice to the output ref.
        o_ref[:, s * g:(s + 1) * g, :] = ((att + 1.0) * xs).astype(o_ref.dtype)


# -------------------------------- wrapper -------------------------------------

def _pick_batch_tile(N, bytes_per_batch, block_budget_bytes):
    """Largest divisor of N whose block stays under the per-step budget."""
    tb_max = max(1, block_budget_bytes // max(1, bytes_per_batch))
    best = 1
    for d in range(1, N + 1):
        if N % d == 0 and d <= tb_max:
            best = d
    return best


def ulsam_forward(x, a_dws, b_dws, w_pt, b_pt, num_splits):
    N, C, H, W = x.shape
    assert C % num_splits == 0
    HW = H * W
    # Lane-dense last dim: required here (true for 16x16 = 256).
    assert HW % 128 == 0, "pad H*W to a multiple of 128 and mask the softmax"

    x2 = x.reshape(N, C, HW)

    # Pack the three fused per-channel vectors into one (C, 4) parameter block:
    # one grid-invariant DMA / buffer slot instead of three.
    params = jnp.stack(
        [a_dws.reshape(C), b_dws.reshape(C), w_pt.reshape(C),
         jnp.zeros((C,), jnp.float32)],
        axis=1).astype(jnp.float32)                       # (C, 4)
    bpt = b_pt.astype(jnp.float32)                        # (num_splits,) SMEM scalars

    itemsize = jnp.dtype(x.dtype).itemsize
    bytes_per_batch = C * HW * itemsize
    # Per-step block budget ~6 MiB -> (in + out) x 2 pipeline buffers <= ~24 MiB,
    # inside v7x's 32 MiB default scoped VMEM (64 MiB physical) with headroom.
    TB = _pick_batch_tile(N, bytes_per_batch, 6 * 1024 * 1024)
    grid = (N // TB,)

    needed_vmem = 4 * TB * bytes_per_batch + (1 << 20)
    cp_kwargs = dict(dimension_semantics=("parallel",))   # megacore split on v7x
    if needed_vmem > (16 << 20):   # above the smallest (v5e) default scoped limit
        cp_kwargs["vmem_limit_bytes"] = int(needed_vmem + (4 << 20))

    param_spec = pl.BlockSpec((C, 4), lambda n: (0, 0))            # VMEM, grid-invariant
    smem_spec = pl.BlockSpec(memory_space=pltpu.MemorySpace.SMEM)  # per-subspace scalars
    x_spec = pl.BlockSpec((TB, C, HW), lambda n: (n, 0, 0))

    kernel = functools.partial(ulsam_kernel, num_splits=num_splits, W=W)

    out = pl.pallas_call(
        kernel,
        out_shape=jax.ShapeDtypeStruct((N, C, HW), x.dtype),
        grid=grid,
        in_specs=[param_spec, smem_spec, x_spec],
        out_specs=x_spec,
        compiler_params=pltpu.CompilerParams(**cp_kwargs),
    )(params, bpt, x2)
    return out.reshape(N, C, H, W)


# ----------------------------- pure-JAX reference ------------------------------

def ulsam_ref(x, a_dws, b_dws, w_pt, b_pt, num_splits):
    N, C, H, W = x.shape
    g = C // num_splits
    outs = []
    for s in range(num_splits):
        xs = x[:, s * g:(s + 1) * g]
        y = jnp.maximum(a_dws[s][None, :, None, None] * xs
                        + b_dws[s][None, :, None, None], 0.0)
        y = lax.reduce_window(
            y, -jnp.inf, lax.max,
            window_dimensions=(1, 1, 3, 3),
            window_strides=(1, 1, 1, 1),
            padding=((0, 0), (0, 0), (1, 1), (1, 1)))
        att = jnp.einsum('nchw,c->nhw', y, w_pt[s]) + b_pt[s]
        att = jnp.maximum(att, 0.0)
        att = jax.nn.softmax(att.reshape(N, -1), axis=-1).reshape(N, 1, H, W)
        outs.append(att * xs + xs)
    return jnp.concatenate(outs, axis=1)


# ---------------------------------- main ---------------------------------------

if __name__ == "__main__":
    N, nin, H, W, num_splits = 2, 8, 16, 16, 2
    G = num_splits
    g = nin // num_splits
    eps = 1e-5

    key = jax.random.PRNGKey(0)
    keys = jax.random.split(key, 13)

    # Deterministic parameter init (shapes follow SubSpace.__init__ per group).
    conv_dws_w = jax.random.normal(keys[0], (G, g), jnp.float32) * 0.5   # (g,1,1,1) depthwise
    conv_dws_b = jax.random.normal(keys[1], (G, g), jnp.float32) * 0.1
    bn1_gamma = jax.random.uniform(keys[2], (G, g), jnp.float32, 0.5, 1.5)
    bn1_beta = jax.random.normal(keys[3], (G, g), jnp.float32) * 0.1
    bn1_mean = jax.random.normal(keys[4], (G, g), jnp.float32) * 0.1
    bn1_var = jax.random.uniform(keys[5], (G, g), jnp.float32, 0.5, 1.5)
    conv_pt_w = jax.random.normal(keys[6], (G, g), jnp.float32) * 0.5    # (1,g,1,1) pointwise
    conv_pt_b = jax.random.normal(keys[7], (G,), jnp.float32) * 0.1
    bn2_gamma = jax.random.uniform(keys[8], (G,), jnp.float32, 0.5, 1.5)
    bn2_beta = jax.random.normal(keys[9], (G,), jnp.float32) * 0.1
    bn2_mean = jax.random.normal(keys[10], (G,), jnp.float32) * 0.1
    bn2_var = jax.random.uniform(keys[11], (G,), jnp.float32, 0.5, 1.5)

    # Fuse conv + (inference-mode) BN into affine scale/bias.
    inv1 = bn1_gamma / jnp.sqrt(bn1_var + eps)
    a_dws = conv_dws_w * inv1
    b_dws = (conv_dws_b - bn1_mean) * inv1 + bn1_beta
    inv2 = bn2_gamma / jnp.sqrt(bn2_var + eps)
    w_pt = conv_pt_w * inv2[:, None]
    b_pt = (conv_pt_b - bn2_mean) * inv2 + bn2_beta

    x = jax.random.normal(keys[12], (N, nin, H, W), jnp.float32)

    out = ulsam_forward(x, a_dws, b_dws, w_pt, b_pt, num_splits)
    jax.block_until_ready(out)

    ref = ulsam_ref(x, a_dws, b_dws, w_pt, b_pt, num_splits)
    assert out.shape == (N, nin, H, W)
    # Tolerance slightly relaxed vs exact division: softmax denominator uses the
    # EUP approximate reciprocal (pl.reciprocal(approx=True)).
    assert jnp.allclose(out, ref, atol=1e-3, rtol=1e-3), \
        f"max abs err {jnp.max(jnp.abs(out - ref))}"

    print("KERNEL_OK")
</pallas_src>

<mosaic_0001>
module attributes {stable_mosaic.version = 11 : i64} {
  func.func @ulsam_kernel(%arg0: i32, %arg1: memref<8x4xf32, #tpu.memory_space<vmem>>, %arg2: memref<2xf32, #tpu.memory_space<smem>>, %arg3: memref<2x8x256xf32, #tpu.memory_space<vmem>>, %arg4: memref<2x8x256xf32, #tpu.memory_space<vmem>>) attributes {dimension_semantics = [#tpu.dimension_semantics<parallel>], iteration_bounds = array<i64: 1>, scalar_prefetch = 0 : i64, scratch_operands = 0 : i64, tpu.core_type = #tpu.core_type<tc>, window_params = [{pipeline_mode = #tpu.pipeline_mode<synchronous>, transform_indices = @transform_0, window_bounds = array<i64: 8, 4>}, {transform_indices = @transform_1, window_bounds = array<i64: 2>}, {transform_indices = @transform_2, window_bounds = array<i64: 2, 8, 256>}, {transform_indices = @transform_3, window_bounds = array<i64: 2, 8, 256>}]} {
    %c0 = arith.constant 0 : index
    %c0_0 = arith.constant 0 : index
    %c0_1 = arith.constant 0 : index
    %0 = vector.load %arg3[%c0, %c0_0, %c0_1] : memref<2x8x256xf32, #tpu.memory_space<vmem>>, vector<2x8x256xf32>
    %c0_2 = arith.constant 0 : index
    %c0_3 = arith.constant 0 : index
    %1 = vector.load %arg1[%c0_2, %c0_3] : memref<8x4xf32, #tpu.memory_space<vmem>>, vector<8x1xf32>
    %c0_4 = arith.constant 0 : index
    %c1 = arith.constant 1 : index
    %2 = vector.load %arg1[%c0_4, %c1] : memref<8x4xf32, #tpu.memory_space<vmem>>, vector<8x1xf32>
    %c0_5 = arith.constant 0 : index
    %c2 = arith.constant 2 : index
    %3 = vector.load %arg1[%c0_5, %c2] : memref<8x4xf32, #tpu.memory_space<vmem>>, vector<8x1xf32>
    %4 = tpu.iota {dimensions = array<i32: 2>} : vector<1x1x256xi32>
    %c16_i32 = arith.constant 16 : i32
    %c0_i32 = arith.constant 0 : i32
    %5 = arith.cmpi eq, %c16_i32, %c0_i32 : i32
    %c1_i32 = arith.constant 1 : i32
    %6 = arith.select %5, %c1_i32, %c16_i32 : i32
    %7 = vector.broadcast %6 : i32 to vector<1x1x256xi32>
    %8 = arith.remsi %4, %7 : vector<1x1x256xi32>
    %c0_i32_6 = arith.constant 0 : i32
    %9 = vector.broadcast %c0_i32_6 : i32 to vector<1x1x256xi32>
    %10 = arith.cmpi ne, %8, %9 : vector<1x1x256xi32>
    %c0_i32_7 = arith.constant 0 : i32
    %11 = vector.broadcast %c0_i32_7 : i32 to vector<1x1x256xi32>
    %12 = arith.cmpi slt, %8, %11 : vector<1x1x256xi32>
    %c0_i32_8 = arith.constant 0 : i32
    %13 = arith.cmpi slt, %6, %c0_i32_8 : i32
    %14 = vector.broadcast %13 : i1 to vector<1x1x256xi1>
    %15 = vector.broadcast %14 : vector<1x1x256xi1> to vector<1x1x256xi1>
    %16 = arith.xori %12, %15 : vector<1x1x256xi1>
    %17 = arith.andi %16, %10 : vector<1x1x256xi1>
    %18 = vector.broadcast %6 : i32 to vector<1x1x256xi32>
    %19 = arith.addi %8, %18 : vector<1x1x256xi32>
    %20 = arith.select %17, %19, %8 : vector<1x1x256xi1>, vector<1x1x256xi32>
    %c0_i32_9 = arith.constant 0 : i32
    %21 = vector.broadcast %c0_i32_9 : i32 to vector<1x1x256xi32>
    %22 = arith.cmpi sgt, %20, %21 : vector<1x1x256xi32>
    %c15_i32 = arith.constant 15 : i32
    %23 = vector.broadcast %c15_i32 : i32 to vector<1x1x256xi32>
    %24 = arith.cmpi slt, %20, %23 : vector<1x1x256xi32>
    %c16_i32_10 = arith.constant 16 : i32
    %25 = vector.broadcast %c16_i32_10 : i32 to vector<1x1x256xi32>
    %26 = arith.cmpi sge, %4, %25 : vector<1x1x256xi32>
    %c240_i32 = arith.constant 240 : i32
    %27 = vector.broadcast %c240_i32 : i32 to vector<1x1x256xi32>
    %28 = arith.cmpi slt, %4, %27 : vector<1x1x256xi32>
    %29 = vector.shape_cast %1 : vector<8x1xf32> to vector<1x8x1xf32>
    %30 = vector.broadcast %29 : vector<1x8x1xf32> to vector<2x8x256xf32>
    %31 = arith.mulf %30, %0 : vector<2x8x256xf32>
    %32 = vector.shape_cast %2 : vector<8x1xf32> to vector<1x8x1xf32>
    %33 = vector.broadcast %32 : vector<1x8x1xf32> to vector<2x8x256xf32>
    %34 = arith.addf %31, %33 : vector<2x8x256xf32>
    %cst = arith.constant 0.000000e+00 : f32
    %35 = vector.broadcast %cst : f32 to vector<2x8x256xf32>
    %36 = arith.maximumf %34, %35 : vector<2x8x256xf32>
    %c1_i32_11 = arith.constant 1 : i32
    %37 = tpu.dynamic_rotate %36 by %c1_i32_11 dim 2 : vector<2x8x256xf32>, i32 -> vector<2x8x256xf32>
    %cst_12 = arith.constant 0.000000e+00 : f32
    %38 = vector.shape_cast %22 : vector<1x1x256xi1> to vector<1x1x256xi1>
    %39 = vector.broadcast %38 : vector<1x1x256xi1> to vector<2x8x256xi1>
    %40 = vector.broadcast %cst_12 : f32 to vector<2x8x256xf32>
    %41 = arith.select %39, %37, %40 : vector<2x8x256xi1>, vector<2x8x256xf32>
    %42 = arith.maximumf %36, %41 : vector<2x8x256xf32>
    %c255_i32 = arith.constant 255 : i32
    %43 = tpu.dynamic_rotate %36 by %c255_i32 dim 2 : vector<2x8x256xf32>, i32 -> vector<2x8x256xf32>
    %cst_13 = arith.constant 0.000000e+00 : f32
    %44 = vector.shape_cast %24 : vector<1x1x256xi1> to vector<1x1x256xi1>
    %45 = vector.broadcast %44 : vector<1x1x256xi1> to vector<2x8x256xi1>
    %46 = vector.broadcast %cst_13 : f32 to vector<2x8x256xf32>
    %47 = arith.select %45, %43, %46 : vector<2x8x256xi1>, vector<2x8x256xf32>
    %48 = arith.maximumf %42, %47 : vector<2x8x256xf32>
    %c16_i32_14 = arith.constant 16 : i32
    %49 = tpu.dynamic_rotate %48 by %c16_i32_14 dim 2 : vector<2x8x256xf32>, i32 -> vector<2x8x256xf32>
    %cst_15 = arith.constant 0.000000e+00 : f32
    %50 = vector.shape_cast %26 : vector<1x1x256xi1> to vector<1x1x256xi1>
    %51 = vector.broadcast %50 : vector<1x1x256xi1> to vector<2x8x256xi1>
    %52 = vector.broadcast %cst_15 : f32 to vector<2x8x256xf32>
    %53 = arith.select %51, %49, %52 : vector<2x8x256xi1>, vector<2x8x256xf32>
    %54 = arith.maximumf %48, %53 : vector<2x8x256xf32>
    %c240_i32_16 = arith.constant 240 : i32
    %55 = tpu.dynamic_rotate %48 by %c240_i32_16 dim 2 : vector<2x8x256xf32>, i32 -> vector<2x8x256xf32>
    %cst_17 = arith.constant 0.000000e+00 : f32
    %56 = vector.shape_cast %28 : vector<1x1x256xi1> to vector<1x1x256xi1>
    %57 = vector.broadcast %56 : vector<1x1x256xi1> to vector<2x8x256xi1>
    %58 = vector.broadcast %cst_17 : f32 to vector<2x8x256xf32>
    %59 = arith.select %57, %55, %58 : vector<2x8x256xi1>, vector<2x8x256xf32>
    %60 = arith.maximumf %54, %59 : vector<2x8x256xf32>
    %61 = vector.shape_cast %3 : vector<8x1xf32> to vector<1x8x1xf32>
    %62 = vector.broadcast %61 : vector<1x8x1xf32> to vector<2x8x256xf32>
    %63 = arith.mulf %62, %60 : vector<2x8x256xf32>
    %64 = vector.extract_strided_slice %63 {offsets = [0, 0, 0], sizes = [2, 4, 256], strides = [1, 1, 1]} : vector<2x8x256xf32> to vector<2x4x256xf32>
    %cst_18 = arith.constant dense<0.000000e+00> : vector<2x256xf32>
    %65 = vector.multi_reduction <add>, %64, %cst_18 [1] : vector<2x4x256xf32> to vector<2x256xf32>
    %66 = vector.shape_cast %65 : vector<2x256xf32> to vector<2x1x256xf32>
    %c0_19 = arith.constant 0 : index
    %67 = memref.load %arg2[%c0_19] : memref<2xf32, #tpu.memory_space<smem>>
    %68 = vector.broadcast %67 : f32 to vector<2x1x256xf32>
    %69 = arith.addf %66, %68 : vector<2x1x256xf32>
    %cst_20 = arith.constant 0.000000e+00 : f32
    %70 = vector.broadcast %cst_20 : f32 to vector<2x1x256xf32>
    %71 = arith.maximumf %69, %70 : vector<2x1x256xf32>
    %cst_21 = arith.constant dense<0xFF800000> : vector<2x1xf32>
    %72 = vector.multi_reduction <maximumf>, %71, %cst_21 [2] : vector<2x1x256xf32> to vector<2x1xf32>
    %73 = vector.shape_cast %72 : vector<2x1xf32> to vector<2x1x1xf32>
    %74 = vector.broadcast %73 : vector<2x1x1xf32> to vector<2x1x256xf32>
    %75 = arith.subf %71, %74 : vector<2x1x256xf32>
    %76 = math.exp %75 : vector<2x1x256xf32>
    %cst_22 = arith.constant dense<0.000000e+00> : vector<2x1xf32>
    %77 = vector.multi_reduction <add>, %76, %cst_22 [2] : vector<2x1x256xf32> to vector<2x1xf32>
    %78 = vector.shape_cast %77 : vector<2x1xf32> to vector<2x1x1xf32>
    %79 = tpu.reciprocal %78 {approx = true} : vector<2x1x1xf32> -> vector<2x1x1xf32>
    %80 = vector.broadcast %79 : vector<2x1x1xf32> to vector<2x1x256xf32>
    %81 = arith.mulf %76, %80 : vector<2x1x256xf32>
    %82 = vector.extract_strided_slice %0 {offsets = [0, 0, 0], sizes = [2, 4, 256], strides = [1, 1, 1]} : vector<2x8x256xf32> to vector<2x4x256xf32>
    %cst_23 = arith.constant 1.000000e+00 : f32
    %83 = vector.broadcast %cst_23 : f32 to vector<2x1x256xf32>
    %84 = arith.addf %81, %83 : vector<2x1x256xf32>
    %85 = vector.broadcast %84 : vector<2x1x256xf32> to vector<2x4x256xf32>
    %86 = arith.mulf %85, %82 : vector<2x4x256xf32>
    %c0_24 = arith.constant 0 : index
    %c0_25 = arith.constant 0 : index
    %c0_26 = arith.constant 0 : index
    %87 = vector.load %arg4[%c0_24, %c0_25, %c0_26] : memref<2x8x256xf32, #tpu.memory_space<vmem>>, vector<2x4x256xf32>
    tpu.vector_store %arg4[%c0_24, %c0_25, %c0_26], %86 {strides = array<i32>} : memref<2x8x256xf32, #tpu.memory_space<vmem>>, vector<2x4x256xf32>,
    %88 = vector.extract_strided_slice %63 {offsets = [0, 4, 0], sizes = [2, 4, 256], strides = [1, 1, 1]} : vector<2x8x256xf32> to vector<2x4x256xf32>
    %cst_27 = arith.constant dense<0.000000e+00> : vector<2x256xf32>
    %89 = vector.multi_reduction <add>, %88, %cst_27 [1] : vector<2x4x256xf32> to vector<2x256xf32>
    %90 = vector.shape_cast %89 : vector<2x256xf32> to vector<2x1x256xf32>
    %c1_28 = arith.constant 1 : index
    %91 = memref.load %arg2[%c1_28] : memref<2xf32, #tpu.memory_space<smem>>
    %92 = vector.broadcast %91 : f32 to vector<2x1x256xf32>
    %93 = arith.addf %90, %92 : vector<2x1x256xf32>
    %cst_29 = arith.constant 0.000000e+00 : f32
    %94 = vector.broadcast %cst_29 : f32 to vector<2x1x256xf32>
    %95 = arith.maximumf %93, %94 : vector<2x1x256xf32>
    %cst_30 = arith.constant dense<0xFF800000> : vector<2x1xf32>
    %96 = vector.multi_reduction <maximumf>, %95, %cst_30 [2] : vector<2x1x256xf32> to vector<2x1xf32>
    %97 = vector.shape_cast %96 : vector<2x1xf32> to vector<2x1x1xf32>
    %98 = vector.broadcast %97 : vector<2x1x1xf32> to vector<2x1x256xf32>
    %99 = arith.subf %95, %98 : vector<2x1x256xf32>
    %100 = math.exp %99 : vector<2x1x256xf32>
    %cst_31 = arith.constant dense<0.000000e+00> : vector<2x1xf32>
    %101 = vector.multi_reduction <add>, %100, %cst_31 [2] : vector<2x1x256xf32> to vector<2x1xf32>
    %102 = vector.shape_cast %101 : vector<2x1xf32> to vector<2x1x1xf32>
    %103 = tpu.reciprocal %102 {approx = true} : vector<2x1x1xf32> -> vector<2x1x1xf32>
    %104 = vector.broadcast %103 : vector<2x1x1xf32> to vector<2x1x256xf32>
    %105 = arith.mulf %100, %104 : vector<2x1x256xf32>
    %106 = vector.extract_strided_slice %0 {offsets = [0, 4, 0], sizes = [2, 4, 256], strides = [1, 1, 1]} : vector<2x8x256xf32> to vector<2x4x256xf32>
    %cst_32 = arith.constant 1.000000e+00 : f32
    %107 = vector.broadcast %cst_32 : f32 to vector<2x1x256xf32>
    %108 = arith.addf %105, %107 : vector<2x1x256xf32>
    %109 = vector.broadcast %108 : vector<2x1x256xf32> to vector<2x4x256xf32>
    %110 = arith.mulf %109, %106 : vector<2x4x256xf32>
    %c0_33 = arith.constant 0 : index
    %c4 = arith.constant 4 : index
    %c0_34 = arith.constant 0 : index
    %111 = vector.load %arg4[%c0_33, %c4, %c0_34] : memref<2x8x256xf32, #tpu.memory_space<vmem>>, vector<2x4x256xf32>
    tpu.vector_store %arg4[%c0_33, %c4, %c0_34], %110 {strides = array<i32>} : memref<2x8x256xf32, #tpu.memory_space<vmem>>, vector<2x4x256xf32>,
    return
  }
  func.func @transform_0(%arg0: i32) -> (i32, i32) {
    %c0_i32 = arith.constant 0 : i32
    %c0_i32_0 = arith.constant 0 : i32
    %c0_i32_1 = arith.constant 0 : i32
    return %c0_i32, %c0_i32_0 : i32, i32
  }
  func.func @transform_1(%arg0: i32) -> i32 {
    %c0_i32 = arith.constant 0 : i32
    %c0_i32_0 = arith.constant 0 : i32
    return %c0_i32 : i32
  }
  func.func @transform_2(%arg0: i32) -> (i32, i32, i32) {
    %c0_i32 = arith.constant 0 : i32
    %c0_i32_0 = arith.constant 0 : i32
    %c0_i32_1 = arith.constant 0 : i32
    return %arg0, %c0_i32, %c0_i32_0 : i32, i32, i32
  }
  func.func @transform_3(%arg0: i32) -> (i32, i32, i32) {
    %c0_i32 = arith.constant 0 : i32
    %c0_i32_0 = arith.constant 0 : i32
    %c0_i32_1 = arith.constant 0 : i32
    return %arg0, %c0_i32, %c0_i32_0 : i32, i32, i32
  }
}

</mosaic_0001>

<bundles_post_ra>
// kernel: tpu_custom_call.1
= control target key start
LH: loop header
LB: loop body
LE: loop exit
PB: predicated region body
PF: predicated region fallthrough
CT: control target
= control target key end

     0   :  { %8 = vsyncpa [#allocation5], 0  ;;  %s678_s0 = inlined_call_operand.vmem [shape: f32[8,4], index: 0, kind: input, shape index: {}]   ;;  %s679_s1 = inlined_call_operand.vmem [shape: f32[2], index: 1, kind: input, shape index: {}]   ;;  %s680_s2 = inlined_call_operand.hbm [shape: f32[2,8,256], index: 2, kind: input, shape index: {}]   ;;  %s681_s3 = inlined_call_operand.hbm [shape: f32[2,8,256], index: 3, kind: output, shape index: {}]  }
   0x1   :  { %9 = vsyncpa [#allocation3], 0 }
   0x2   :  { %10 = vsyncpa [#allocation4], 0  ;;  %s19_s14 = sshll.u32 %s679_s1, 4  ;;  %s20_s14 = int_to_ptr.vmem [resolvable:$true] %s19_s14 }
   0x3   :  { %s442_s15 = scalar_lea.vmem %s20_s14, 16  ;;  %p447_p1 = scmp.lt.s32.totalorder %s20_s14, %s20_s14 }
   0x4   :  { %p443_p0 = scmp.ne.s32.totalorder %s20_s14, %s442_s15  ;;  %p448_p2 = scmp.lt.s32.totalorder %s442_s15, %s442_s15 }
   0x6   :  { %p449_p3 = por %p448_p2, %p447_p1 }
   0x8   :  { %p450_p4 = pnand %p449_p3, %p443_p0 }
   0xa   :  { %453 = shalt.err (!%p450_p4)
}
   0xb   :  { %s500_s16 = smov [#allocation2]   ;;  %s501_s17 = smov [#allocation6]  }
   0xc   :  { %22 = dma.vmem_to_smem %s20_s14, 16, %s500_s16, [#allocation5]  }
   0xd   :  { %s28_s18 = sshll.u32 %s501_s17, 4  ;;  %s29_s18 = int_to_ptr.vmem [resolvable:$true] %s28_s18 }
   0xe   :  { %s462_s19 = scalar_lea.vmem %s29_s18, 512  ;;  %p467_p6 = scmp.lt.s32.totalorder %s29_s18, %s29_s18 }
   0xf   :  { %p463_p5 = scmp.ne.s32.totalorder %s29_s18, %s462_s19  ;;  %p468_p7 = scmp.lt.s32.totalorder %s462_s19, %s462_s19 }
  0x11   :  { %p469_p8 = por %p468_p7, %p467_p6 }
  0x13   :  { %p470_p9 = pnand %p469_p8, %p463_p5 }
  0x15   :  { %473 = shalt.err (!%p470_p9)
}
  0x16   :  { %s502_s1 = smov 256   ;;  %s503_s20 = smov 16  }
  0x17   :  { %34 = dma.hbm_to_vmem [thread:$0]  %s680_s2, 512, %s29_s18, [#allocation3], %s502_s1, %s502_s1, %s503_s20  }
  0x18   :  { %494 = dma.done.wait [#allocation5], 16  }
  0x19   :  { %495 = vsyncadd [#allocation5], 4294967280 }
  0x1a   :  { %496 = dma.done.wait [#allocation3], 512  }
  0x1b   :  { %497 = vsyncadd [#allocation3], 4294966784 }
  0x1c   :  { %41 = sfence }
  0x1d   :  { %v46_v0 = vld [vmem:[%s678_s0] sm:$0xff]  ;;  %v504_v1 = vmov 0   ;;  %v505_v2 = vmov 1   ;;  %v545_v5 = vld [vmem:[#allocation6 + $0x18] sm:$0xff]  ;;  %v547_v6 = vld [vmem:[#allocation6 + $0x10] sm:$0xff]  ;;  %v506_v7 = vmov 2   ;;  %v47_v22 = vlaneseq }
  0x1e   :  { %414 = vset.pattern.permute.xlu0 %v504_v1  ;;  %v543_v4 = vld [vmem:[#allocation6] sm:$0xff]  ;;  %416 = vset.pattern.permute.xlu1 %v506_v7  ;;  %v552_v14 = vld [vmem:[#allocation6 + $0x8] sm:$0xff]  ;;  %s507_s0 = smov 1   ;;  %s508_s2 = smov 127   ;;  %vm211_vm10 = vcmask 1043456  }
  0x1f   :  { %84 = vperm.xlu0 %414, %v46_v0   ;;  %v555_v23 = vand.u32 127, %v47_v22  ;;  %s509_s25 = smov 112   ;;  %s240_s26 = sld [smem:[#allocation2]] }
  0x20   :  { %s402_s27 = sld [smem:[#allocation2 + $0x1]]  ;;  %s510_s28 = smov [#allocation7]  }
  0x21   :  { %v558_v24 = vadd.s32 128, %v555_v23  ;;  %v54_v25 = vand.u32 15, %v555_v23  ;;  %vm111_vm0 = vcmp.lt.s32.totalorder %v555_v23, 1  ;;  %vm136_vm2 = vcmp.lt.s32.totalorder %v555_v23, 127  ;;  %s389_s29 = sshll.u32 %s510_s28, 4  ;;  %s390_s29 = int_to_ptr.vmem [resolvable:$true] %s389_s29 }
  0x22   :  { %vm186_vm6 = vcmp.lt.s32.totalorder %v555_v23, 112  ;;  %vm161_vm7 = vcmp.lt.s32.totalorder %v555_v23, 16  ;;  %vm78_vm9 = vcmp.ge.s32.totalorder %v555_v23, 16  ;;  %s474_s30 = scalar_lea.vmem %s390_s29, 512  ;;  %p479_p11 = scmp.lt.s32.totalorder %s390_s29, %s390_s29 }
  0x23   :  { %415 = vset.pattern.permute.xlu0 %v505_v2  ;;  %v61_v28 = vand.u32 15, %v558_v24  ;;  %vm563_vm1 = vcmp.gt.s32.totalorder %v54_v25, 0  ;;  %vm578_vm4 = vcmp.lt.s32.totalorder %v54_v25, 15  ;;  %vm81_vm8 = vcmp.lt.s32.totalorder %v558_v24, 240  ;;  %p475_p10 = scmp.ne.s32.totalorder %s390_s29, %s474_s30  ;;  %p480_p12 = scmp.lt.s32.totalorder %s474_s30, %s474_s30 }
  0x24   :  { %92 = vperm.xlu0 %415, %v46_v0  }
  0x25   :  { %vm572_vm3 = vcmp.gt.s32.totalorder %v61_v28, 0  ;;  %vm582_vm5 = vcmp.lt.s32.totalorder %v61_v28, 15  ;;  %p481_p13 = por %p480_p12, %p479_p11 }
  0x27   :  { %p482_p0 = pnand %p481_p13, %p475_p10 }
  0x28   :  { %417 = vset.pattern.permute.xlu0 %v506_v7 }
  0x9a   :  { %v85_v3 = vpop.permute.xlu0 %84 }
  0x9b   :  { %v87_v8 = vmul.f32 %v85_v3, %v543_v4  ;;  %v90_v9 = vmul.f32 %v85_v3, %v545_v5  ;;  %v89_v11 = vmul.f32 %v85_v3, %v547_v6  ;;  %v88_v18 = vmul.f32 %v85_v3, %v552_v14 }
  0x9f   :  { %v93_v10 = vpop.permute.xlu0 %92 }
  0xa0   :  { %v98_v12 = vadd.f32 %v93_v10, %v90_v9  ;;  %v95_v13 = vadd.f32 %v93_v10, %v87_v8  ;;  %v97_v17 = vadd.f32 %v93_v10, %v89_v11  ;;  %v96_v20 = vadd.f32 %v93_v10, %v88_v18 }
  0xa2   :  { %v102_v15 = vmax.f32 %v98_v12, 0.0  ;;  %v99_v16 = vmax.f32 %v95_v13, 0.0  ;;  %v101_v19 = vmax.f32 %v97_v17, 0.0  ;;  %v100_v21 = vmax.f32 %v96_v20, 0.0 }
  0xa4   :  { %109 = vrot.lane.b32.xlu0 %v102_v15, %s507_s0  ;;  %103 = vrot.lane.b32.xlu1 %v99_v16, %s507_s0 }
  0xa8   :  { %130 = vrot.lane.b32.xlu0 %v101_v19, %s508_s2  ;;  %105 = vrot.lane.b32.xlu1 %v101_v19, %s507_s0 }
  0xac   :  { %134 = vrot.lane.b32.xlu0 %v102_v15, %s508_s2  ;;  %107 = vrot.lane.b32.xlu1 %v100_v21, %s507_s0 }
  0xb0   :  { %128 = vrot.lane.b32.xlu1 %v99_v16, %s508_s2 }
  0xb4   :  { %132 = vrot.lane.b32.xlu1 %v100_v21, %s508_s2 }
  0xb8   :  { %204 = vperm.xlu1 %416, %v46_v0  }
 0x116   :  { %v110_v26 = vpop.permute.xlu0 %109  ;;  %v104_v27 = vpop.permute.xlu1 %103 }
 0x11a   :  { %v131_v30 = vpop.permute.xlu0 %130  ;;  %v106_v31 = vpop.permute.xlu1 %105 }
 0x11b   :  { %v115_v32 = vsel %vm111_vm0, %v110_v26, %v106_v31  ;;  %v113_v35 = vsel %vm111_vm0, %v106_v31, %v110_v26 }
 0x11c   :  { %v122_v33 = vsel %vm563_vm1, %v115_v32, 0.0  ;;  %v123_v43 = vsel %vm572_vm3, %v113_v35, 0.0 }
 0x11d   :  { %v126_v39 = vmax.f32 %v101_v19, %v122_v33  ;;  %v127_v49 = vmax.f32 %v102_v15, %v123_v43 }
 0x11e   :  { %v135_v37 = vpop.permute.xlu0 %134  ;;  %v108_v38 = vpop.permute.xlu1 %107 }
 0x11f   :  { %v138_v41 = vsel %vm136_vm2, %v131_v30, %v135_v37  ;;  %v140_v42 = vsel %vm136_vm2, %v135_v37, %v131_v30  ;;  %v114_v46 = vsel %vm111_vm0, %v108_v38, %v104_v27  ;;  %v112_v52 = vsel %vm111_vm0, %v104_v27, %v108_v38 }
 0x120   :  { %v147_v44 = vsel %vm578_vm4, %v138_v41, 0.0  ;;  %v148_v47 = vsel %vm582_vm5, %v140_v42, 0.0  ;;  %v120_v50 = vsel %vm563_vm1, %v114_v46, 0.0  ;;  %v121_v57 = vsel %vm572_vm3, %v112_v52, 0.0 }
 0x121   :  { %v594_v45 = vmax.f32 %v126_v39, %v147_v44  ;;  %v604_v51 = vmax.f32 %v127_v49, %v148_v47  ;;  %v124_v54 = vmax.f32 %v99_v16, %v120_v50  ;;  %v125_v61 = vmax.f32 %v100_v21, %v121_v57 }
 0x122   :  { %v129_v48 = vpop.permute.xlu1 %128  ;;  %v241_v50 = vstv %s240_s26  ;;  %v654_v52 = vstv %s402_s27 }
 0x123   :  { %155 = vrot.lane.b32.xlu0 %v594_v45, %s503_s20 }
 0x126   :  { %v133_v53 = vpop.permute.xlu1 %132 }
 0x127   :  { %v137_v55 = vsel %vm136_vm2, %v129_v48, %v133_v53  ;;  %v139_v56 = vsel %vm136_vm2, %v133_v53, %v129_v48  ;;  %159 = vrot.lane.b32.xlu0 %v604_v51, %s503_s20 }
 0x128   :  { %v145_v58 = vsel %vm578_vm4, %v137_v55, 0.0  ;;  %v146_v60 = vsel %vm582_vm5, %v139_v56, 0.0 }
 0x129   :  { %v149_v59 = vmax.f32 %v124_v54, %v145_v58  ;;  %v150_v62 = vmax.f32 %v125_v61, %v146_v60 }
 0x12b   :  { %178 = vrot.lane.b32.xlu0 %v149_v59, %s509_s25  ;;  %153 = vrot.lane.b32.xlu1 %v149_v59, %s503_s20 }
 0x12f   :  { %182 = vrot.lane.b32.xlu0 %v150_v62, %s509_s25  ;;  %157 = vrot.lane.b32.xlu1 %v150_v62, %s503_s20 }
 0x133   :  { %180 = vrot.lane.b32.xlu1 %v594_v45, %s509_s25  ;;  %v205_v0 = vpop.permute.xlu1 %204 }
 0x137   :  { %184 = vrot.lane.b32.xlu1 %v604_v51, %s509_s25 }
 0x195   :  { %v156_v63 = vpop.permute.xlu0 %155 }
 0x199   :  { %v160_v1 = vpop.permute.xlu0 %159 }
 0x19a   :  { %v165_v12 = vsel %vm161_vm7, %v160_v1, %v156_v63  ;;  %v163_v21 = vsel %vm161_vm7, %v156_v63, %v160_v1 }
 0x19b   :  { %v172_v22 = vsel %vm78_vm9, %v165_v12, 0.0  ;;  %v177_v29 = vmax.f32 %v604_v51, %v163_v21 }
 0x19c   :  { %v176_v28 = vmax.f32 %v594_v45, %v172_v22 }
 0x19d   :  { %v179_v2 = vpop.permute.xlu0 %178  ;;  %v154_v3 = vpop.permute.xlu1 %153 }
 0x1a1   :  { %v183_v7 = vpop.permute.xlu0 %182  ;;  %v158_v8 = vpop.permute.xlu1 %157 }
 0x1a2   :  { %v189_v9 = vsel %vm186_vm6, %v183_v7, %v179_v2  ;;  %v162_v10 = vsel %vm161_vm7, %v154_v3, %v158_v8  ;;  %v164_v11 = vsel %vm161_vm7, %v158_v8, %v154_v3  ;;  %v187_v18 = vsel %vm186_vm6, %v179_v2, %v183_v7 }
 0x1a3   :  { %v196_v13 = vsel %vm81_vm8, %v189_v9, 0.0  ;;  %v170_v15 = vsel %vm78_vm9, %v164_v11, 0.0  ;;  %v175_v16 = vmax.f32 %v150_v62, %v162_v10 }
 0x1a4   :  { %v174_v17 = vmax.f32 %v149_v59, %v170_v15 }
 0x1a5   :  { %v200_v19 = vmax.f32 %v175_v16, %v196_v13  ;;  %v181_v20 = vpop.permute.xlu1 %180 }
 0x1a6   :  { %v199_v25 = vmax.f32 %v174_v17, %v187_v18 }
 0x1a7   :  { %v208_v26 = vmul.f32 %v205_v0, %v200_v19 }
 0x1a8   :  { %v207_v27 = vmul.f32 %v205_v0, %v199_v25 }
 0x1a9   :  { %v219_v30 = vsel %vm211_vm10, %v208_v26, 0.0  ;;  %v297_v31 = vrot.slane %v208_v26, 4  ;;  %v185_v32 = vpop.permute.xlu1 %184 }
 0x1aa   :  { %v212_v33 = vsel %vm211_vm10, %v207_v27, 0.0  ;;  %v220_v34 = vrot.slane %v219_v30, 4  ;;  %v296_v35 = vrot.slane %v207_v27, 4  ;;  %v188_v36 = vsel %vm186_vm6, %v181_v20, %v185_v32 }
 0x1ab   :  { %v213_v37 = vrot.slane %v212_v33, 4  ;;  %v311_v38 = vsel %vm211_vm10, %v297_v31, 0.0  ;;  %v190_v39 = vsel %vm186_vm6, %v185_v32, %v181_v20  ;;  %v201_v40 = vmax.f32 %v176_v28, %v188_v36 }
 0x1ac   :  { %v221_v41 = vadd.f32 %v220_v34, %v219_v30  ;;  %v312_v42 = vrot.slane %v311_v38, 4  ;;  %v198_v43 = vsel %vm81_vm8, %v190_v39, 0.0  ;;  %v304_v44 = vsel %vm211_vm10, %v296_v35, 0.0 }
 0x1ad   :  { %v202_v45 = vmax.f32 %v177_v29, %v198_v43  ;;  %v209_v46 = vmul.f32 %v205_v0, %v201_v40  ;;  %v214_v47 = vadd.f32 %v213_v37, %v212_v33  ;;  %v305_v48 = vrot.slane %v304_v44, 4 }
 0x1ae   :  { %v222_v49 = vrot.slane %v221_v41, 2  ;;  %v313_v51 = vadd.f32 %v312_v42, %v311_v38 }
 0x1af   :  { %v210_v53 = vmul.f32 %v205_v0, %v202_v45  ;;  %v226_v23 = vsel %vm211_vm10, %v209_v46, 0.0  ;;  %v298_v54 = vrot.slane %v209_v46, 4  ;;  %v215_v55 = vrot.slane %v214_v47, 2 }
 0x1b0   :  { %v227_v56 = vrot.slane %v226_v23, 4  ;;  %v223_v57 = vadd.f32 %v222_v49, %v221_v41  ;;  %v306_v24 = vadd.f32 %v305_v48, %v304_v44  ;;  %v314_v58 = vrot.slane %v313_v51, 2 }
 0x1b1   :  { %v233_v59 = vsel %vm211_vm10, %v210_v53, 0.0  ;;  %v299_v60 = vrot.slane %v210_v53, 4  ;;  %v318_v61 = vsel %vm211_vm10, %v298_v54, 0.0  ;;  %v216_v62 = vadd.f32 %v215_v55, %v214_v47 }
 0x1b2   :  { %v228_v63 = vadd.f32 %v227_v56, %v226_v23  ;;  %v234_v1 = vrot.slane %v233_v59, 4  ;;  %v319_v2 = vrot.slane %v318_v61, 4  ;;  %v224_v3 = vrot.slane %v223_v57, 1 }
 0x1b3   :  { %v325_v0 = vsel %vm211_vm10, %v299_v60, 0.0  ;;  %v217_v7 = vrot.slane %v216_v62, 1  ;;  %v307_v8 = vrot.slane %v306_v24, 2  ;;  %v315_v9 = vadd.f32 %v314_v58, %v313_v51 }
 0x1b4   :  { %v229_v10 = vrot.slane %v228_v63, 2  ;;  %v235_v11 = vadd.f32 %v234_v1, %v233_v59  ;;  %v320_v12 = vadd.f32 %v319_v2, %v318_v61  ;;  %v326_v13 = vrot.slane %v325_v0, 4 }
 0x1b5   :  { %v218_v15 = vadd.f32 %v217_v7, %v216_v62  ;;  %v225_v16 = vadd.f32 %v224_v3, %v223_v57  ;;  %v308_v17 = vadd.f32 %v307_v8, %v306_v24  ;;  %v316_v18 = vrot.slane %v315_v9, 1 }
 0x1b6   :  { %v230_v19 = vadd.f32 %v229_v10, %v228_v63  ;;  %v236_v20 = vrot.slane %v235_v11, 2  ;;  %v321_v21 = vrot.slane %v320_v12, 2  ;;  %v327_v22 = vadd.f32 %v326_v13, %v325_v0 }
 0x1b7   :  { %v242_v25 = vadd.f32 %v241_v50, %v218_v15  ;;  %v243_v26 = vadd.f32 %v241_v50, %v225_v16  ;;  %v309_v27 = vrot.slane %v308_v17, 1  ;;  %v317_v28 = vadd.f32 %v316_v18, %v315_v9 }
 0x1b8   :  { %v231_v29 = vrot.slane %v230_v19, 1  ;;  %v237_v30 = vadd.f32 %v236_v20, %v235_v11  ;;  %v322_v31 = vadd.f32 %v321_v21, %v320_v12  ;;  %v328_v32 = vrot.slane %v327_v22, 2 }
 0x1b9   :  { %v246_v33 = vmax.f32 %v242_v25, 0.0  ;;  %v247_v34 = vmax.f32 %v243_v26, 0.0  ;;  %v310_v35 = vadd.f32 %v309_v27, %v308_v17  ;;  %v335_v36 = vadd.f32 %v654_v52, %v317_v28 }
 0x1ba   :  { %v232_v37 = vadd.f32 %v231_v29, %v230_v19  ;;  %v238_v38 = vrot.slane %v237_v30, 1  ;;  %v323_v39 = vrot.slane %v322_v31, 1  ;;  %v329_v40 = vadd.f32 %v328_v32, %v327_v22 }
 0x1bb   :  { %v250_v41 = vmax.f32 %v246_v33, %v247_v34  ;;  %v334_v42 = vadd.f32 %v654_v52, %v310_v35  ;;  %v339_v43 = vmax.f32 %v335_v36, 0.0 }
 0x1bc   :  { %v239_v44 = vadd.f32 %v238_v38, %v237_v30  ;;  %v244_v45 = vadd.f32 %v241_v50, %v232_v37  ;;  %v324_v46 = vadd.f32 %v323_v39, %v322_v31  ;;  %v330_v47 = vrot.slane %v329_v40, 1 }
 0x1bd   :  { %251 = vmax.xlane.f32.xlu0 %v250_v41  ;;  %v338_v48 = vmax.f32 %v334_v42, 0.0 }
 0x1be   :  { %v245_v49 = vadd.f32 %v241_v50, %v239_v44  ;;  %v248_v51 = vmax.f32 %v244_v45, 0.0  ;;  %v331_v53 = vadd.f32 %v330_v47, %v329_v40  ;;  %v336_v23 = vadd.f32 %v654_v52, %v324_v46 }
 0x1bf   :  { %v342_v54 = vmax.f32 %v338_v48, %v339_v43 }
 0x1c0   :  { %v249_v55 = vmax.f32 %v245_v49, 0.0  ;;  %v337_v56 = vadd.f32 %v654_v52, %v331_v53  ;;  %v340_v57 = vmax.f32 %v336_v23, 0.0 }
 0x1c1   :  { %343 = vmax.xlane.f32.xlu0 %v342_v54 }
 0x1c2   :  { %v253_v24 = vmax.f32 %v248_v51, %v249_v55  ;;  %v341_v58 = vmax.f32 %v337_v56, 0.0 }
 0x1c4   :  { %254 = vmax.xlane.f32.xlu1 %v253_v24  ;;  %v345_v59 = vmax.f32 %v340_v57, %v341_v58 }
 0x1c6   :  { %346 = vmax.xlane.f32.xlu0 %v345_v59 }
 0x246   :  { %v252_v60 = vpop.xlane.xlu0 %251 }
 0x247   :  { %v256_v61 = vsub.f32 %v246_v33, %v252_v60  ;;  %v257_v62 = vsub.f32 %v247_v34, %v252_v60 }
 0x249   :  { %v260_v63 = vmul.f32 1.442695, %v256_v61  ;;  %v262_v50 = vmul.f32 1.442695, %v257_v62 }
 0x24a   :  { %v344_v1 = vpop.xlane.xlu0 %343 }
 0x24b   :  { %418 = vpow2.f32 %v260_v63  ;;  %v348_v2 = vsub.f32 %v338_v48, %v344_v1  ;;  %v349_v3 = vsub.f32 %v339_v43, %v344_v1 }
 0x24c   :  { %420 = vpow2.f32 %v262_v50 }
 0x24d   :  { %v352_v0 = vmul.f32 1.442695, %v348_v2  ;;  %v354_v7 = vmul.f32 1.442695, %v349_v3  ;;  %v255_v52 = vpop.xlane.xlu1 %254 }
 0x24e   :  { %v258_v8 = vsub.f32 %v248_v51, %v255_v52  ;;  %v259_v9 = vsub.f32 %v249_v55, %v255_v52 }
 0x24f   :  { %422 = vpow2.f32 %v352_v0  ;;  %v347_v10 = vpop.xlane.xlu0 %346 }
 0x250   :  { %424 = vpow2.f32 %v354_v7  ;;  %v264_v11 = vmul.f32 1.442695, %v258_v8  ;;  %v266_v12 = vmul.f32 1.442695, %v259_v9  ;;  %v350_v13 = vsub.f32 %v340_v57, %v347_v10 }
 0x251   :  { %v351_v15 = vsub.f32 %v341_v58, %v347_v10 }
 0x252   :  { %426 = vpow2.f32 %v264_v11  ;;  %v356_v16 = vmul.f32 1.442695, %v350_v13 }
 0x253   :  { %428 = vpow2.f32 %v266_v12  ;;  %v358_v17 = vmul.f32 1.442695, %v351_v15 }
 0x254   :  { %430 = vpow2.f32 %v356_v16 }
 0x255   :  { %432 = vpow2.f32 %v358_v17 }
 0x258   :  { %v419_v18 = vpop.eup %418 }
 0x259   :  { %v421_v19 = vpop.eup %420 }
 0x25a   :  { %v268_v20 = vadd.f32 %v421_v19, %v419_v18 }
 0x25c   :  { %v423_v21 = vpop.eup %422  ;;  %269 = vadd.xlane.f32.xlu1 %v268_v20 }
 0x25d   :  { %v425_v22 = vpop.eup %424 }
 0x25e   :  { %v360_v25 = vadd.f32 %v425_v22, %v423_v21 }
 0x25f   :  { %v427_v26 = vpop.eup %426 }
 0x260   :  { %v429_v27 = vpop.eup %428  ;;  %361 = vadd.xlane.f32.xlu1 %v360_v25 }
 0x261   :  { %v431_v28 = vpop.eup %430  ;;  %v271_v29 = vadd.f32 %v429_v27, %v427_v26 }
 0x262   :  { %v433_v30 = vpop.eup %432 }
 0x263   :  { %272 = vadd.xlane.f32.xlu0 %v271_v29  ;;  %v363_v31 = vadd.f32 %v433_v30, %v431_v28 }
 0x267   :  { %364 = vadd.xlane.f32.xlu0 %v363_v31 }
 0x2e5   :  { %v270_v32 = vpop.xlane.xlu1 %269 }
 0x2e6   :  { %434 = vrcp.f32 %v270_v32 }
 0x2e9   :  { %v362_v33 = vpop.xlane.xlu1 %361 }
 0x2ea   :  { %436 = vrcp.f32 %v362_v33 }
 0x2ec   :  { %v273_v34 = vpop.xlane.xlu0 %272 }
 0x2ed   :  { %438 = vrcp.f32 %v273_v34 }
 0x2f0   :  { %v365_v35 = vpop.xlane.xlu0 %364 }
 0x2f1   :  { %440 = vrcp.f32 %v365_v35 }
 0x2f3   :  { %v435_v36 = vpop.eup %434 }
 0x2f4   :  { %v276_v37 = vmul.f32 %v435_v36, %v419_v18  ;;  %v277_v38 = vmul.f32 %v435_v36, %v421_v19 }
 0x2f6   :  { %v280_v39 = vadd.f32 1.0, %v276_v37  ;;  %v281_v40 = vadd.f32 1.0, %v277_v38 }
 0x2f7   :  { %v437_v41 = vpop.eup %436 }
 0x2f8   :  { %v284_v42 = vmul.f32 %v280_v39, %v543_v4  ;;  %v285_v43 = vmul.f32 %v281_v40, %v552_v14  ;;  %v368_v44 = vmul.f32 %v437_v41, %v423_v21  ;;  %v369_v45 = vmul.f32 %v437_v41, %v425_v22 }
 0x2fa   :  { %v439_v46 = vpop.eup %438  ;;  %288 = vst [vmem:[#allocation7] sm:$0xf] %v284_v42  ;;  %289 = vst [vmem:[#allocation7 + $0x8] sm:$0xf] %v285_v43  ;;  %v372_v47 = vadd.f32 1.0, %v368_v44  ;;  %v373_v48 = vadd.f32 1.0, %v369_v45 }
 0x2fb   :  { %v278_v49 = vmul.f32 %v439_v46, %v427_v26  ;;  %v279_v51 = vmul.f32 %v439_v46, %v429_v27 }
 0x2fc   :  { %v376_v53 = vmul.f32 %v372_v47, %v543_v4  ;;  %v377_v23 = vmul.f32 %v373_v48, %v552_v14 }
 0x2fd   :  { %v282_v54 = vadd.f32 1.0, %v278_v49  ;;  %v283_v55 = vadd.f32 1.0, %v279_v51 }
 0x2fe   :  { %v441_v56 = vpop.eup %440  ;;  %380 = vst [vmem:[#allocation7] sm:$0xf0] %v376_v53  ;;  %381 = vst [vmem:[#allocation7 + $0x8] sm:$0xf0] %v377_v23 }
 0x2ff   :  { %v286_v57 = vmul.f32 %v282_v54, %v547_v6  ;;  %v287_v24 = vmul.f32 %v283_v55, %v545_v5  ;;  %v370_v58 = vmul.f32 %v441_v56, %v431_v28  ;;  %v371_v59 = vmul.f32 %v441_v56, %v433_v30 }
 0x301   :  { %290 = vst [vmem:[#allocation7 + $0x10] sm:$0xf] %v286_v57  ;;  %291 = vst [vmem:[#allocation7 + $0x18] sm:$0xf] %v287_v24  ;;  %v374_v60 = vadd.f32 1.0, %v370_v58  ;;  %v375_v61 = vadd.f32 1.0, %v371_v59 }
 0x303   :  { %v378_v4 = vmul.f32 %v374_v60, %v547_v6  ;;  %v379_v14 = vmul.f32 %v375_v61, %v545_v5 }
 0x305   :  { %382 = vst [vmem:[#allocation7 + $0x10] sm:$0xf0] %v378_v4  ;;  %383 = vst [vmem:[#allocation7 + $0x18] sm:$0xf0] %v379_v14 }
 0x306   :  { %485 = shalt.err (!%p482_p0)
}
 0x307   :  { %395 = dma.vmem_to_hbm [thread:$0]  %s390_s29, 512, %s681_s3, [#allocation4], %s502_s1, %s502_s1, %s503_s20  }
 0x308   :  { %498 = dma.done.wait [#allocation4], 512  }
 0x309   :  { %499 = vsyncadd [#allocation4], 4294966784 }
 0x30a   :  { %399 = vsyncpa [#allocation3], 1 }
 0x30b   :  { %400 = vsyncpa [#allocation4], 1 }
 0x30c   :  { %401 = vsyncpa [#allocation5], 1 }

</bundles_post_ra>
